<compile_context>
chip_gen: v5e
topology: v5e:2x2
jax: 0.10.0
libtpu: 0.0.40
codegen_flags: <defaults>
</compile_context>

<pallas_src>
import jax
import jax.numpy as jnp
import numpy as np
from jax import lax
from jax.experimental import pallas as pl
from jax.experimental.pallas import tpu as pltpu

FX_ONE = 1 << 10          # fixed-point one (1024)
_FX_SHIFT = 10
_XLO_BITS = 11            # x = xh * 2^11 + xl, xl in [0, 2048)
_RBITS = 22               # random bits used for the stochastic-rounding draw


def _i32(v):
    """Python int with the same low 32 bits, as a signed int32 value."""
    v &= 0xFFFFFFFF
    return v - (1 << 32) if v >= (1 << 31) else v


_GOLD = _i32(0x9E3779B9)
_MIX1 = _i32(0x85EBCA6B)
_MIX2 = _i32(0xC2B2AE35)


def _srl(v, k):
    """Logical right shift of an int32 array by a static amount k."""
    return (v >> k) & ((1 << (32 - k)) - 1)


def _fmix32(h):
    """murmur3 finalizer: int32 avalanche hash (wrapping arithmetic)."""
    h = h ^ _srl(h, 16)
    h = h * _MIX1
    h = h ^ _srl(h, 13)
    h = h * _MIX2
    h = h ^ _srl(h, 16)
    return h


def _make_dropout_kernel(rate):
    """Build the kernel body with all rate-derived constants folded in on the host."""
    q21 = (1 << 21) // rate            # 2^21 = q21 * rate + s21
    s21 = (1 << 21) % rate
    thr = (1 << _RBITS) // rate        # stochastic-rounding threshold scale
    bias = FX_ONE                      # keeps the small dividend non-negative
    inv_rate = float(np.float32(1.0 / rate))

    def kernel(seed_ref, x_ref, o_ref):
        x = x_ref[...]
        rows, cols = x.shape

        # ---- counter-based PRNG: one 32-bit hash per element -------------------
        row = lax.broadcasted_iota(jnp.int32, (rows, cols), 0)
        col = lax.broadcasted_iota(jnp.int32, (rows, cols), 1)
        idx = pl.program_id(0) * (rows * cols) + row * cols + col  # global flat index
        h = _fmix32(idx * _GOLD + seed_ref[0])
        noise = h & (FX_ONE - 1)                  # uniform in [0, 1024)
        keep = noise >= rate                      # mask = (rate <= noise)
        rbits = _srl(h, _FX_SHIFT)                # 22 fresh random bits

        # ---- exact floor((x << 10) / rate) with no integer division -------------
        xh = x >> _XLO_BITS                       # floor(x / 2048), arithmetic shift
        xl = x - (xh << _XLO_BITS)                # in [0, 2048)
        u = xh * s21 + (xl << _FX_SHIFT) + bias * rate   # in [1024, ~2^23): exact in f32
        qu = (u.astype(jnp.float32) * inv_rate).astype(jnp.int32)   # trunc == floor (u >= 0)
        r = u - qu * rate
        # f32 rounding can leave qu off by +-1; one correction step makes it exact.
        qu = qu + (r >= rate).astype(jnp.int32) - (r < 0).astype(jnp.int32)
        r = u - qu * rate                         # == (x << 10) mod rate, in [0, rate)
        div = xh * q21 + (qu - bias)              # == floor((x << 10) / rate)

        # ---- stochastic rounding: round up with probability ~ r / rate ----------
        round_up = (rbits < r * thr).astype(jnp.int32)

        o_ref[...] = jnp.where(keep, div + round_up, 0)

    return kernel


def dropout_forward(x, rate_fx, seed, is_t=True, block_elems=512 * 1024):
    """Fixed-point dropout forward.

    x        : int32 fixed-point activations (any shape, x.size % 128 == 0, |x| < 2^21)
    rate_fx  : dropout rate in fx encoding (static python int, 1 <= rate_fx <= 1024)
    seed     : python int or int32 scalar (goes to SMEM; may change without recompile)
    is_t     : training flag; eval mode is a pass-through, as in the reference
    """
    if not is_t:
        return x

    rate = int(rate_fx)
    assert 1 <= rate <= FX_ONE, "rate_fx must be in [1, 1024]"

    x = jnp.asarray(x, dtype=jnp.int32)
    orig_shape = x.shape
    total = x.size
    assert total % 128 == 0, "flattened size must be a multiple of 128 lanes"

    # Lane-dense 2-D slab with the widest last dim that divides the flat size
    # (wide rows -> fewer, fully unmasked vector stores / DMA descriptors).
    cols = 128
    for c in (4096, 2048, 1024, 512, 256):
        if total % c == 0:
            cols = c
            break
    rows = total // cols
    x2 = x.reshape(rows, cols)

    # Large blocks (~2 MiB of int32 by default) amortize the ~0.35 us per-step
    # pipeline overhead; in+out double buffering stays well inside the scoped-VMEM
    # limit on v5e/v6e/v7x.  block_rows is a multiple of 8 unless it covers all rows.
    desired = max(8, (block_elems // cols) // 8 * 8)
    block_rows = rows if rows <= desired else desired
    grid = (pl.cdiv(rows, block_rows),)

    seed_arr = jnp.asarray(seed, dtype=jnp.int32).reshape((1,))

    out = pl.pallas_call(
        _make_dropout_kernel(rate),
        out_shape=jax.ShapeDtypeStruct((rows, cols), jnp.int32),
        grid_spec=pltpu.PrefetchScalarGridSpec(
            num_scalar_prefetch=1,                 # seed -> SMEM
            grid=grid,
            in_specs=[pl.BlockSpec((block_rows, cols), lambda i, seed_ref: (i, 0))],
            out_specs=pl.BlockSpec((block_rows, cols), lambda i, seed_ref: (i, 0)),
        ),
        compiler_params=pltpu.CompilerParams(
            dimension_semantics=("parallel",)),    # independent blocks; lets v7x use both TCs
        input_output_aliases={1: 0},               # write the result back over x's buffer
    )(seed_arr, x2)

    return out.reshape(orig_shape)


if __name__ == "__main__":
    key = jax.random.PRNGKey(0)

    # NCHW int32 fixed-point activations, small demo shape.
    x_fp = jax.random.uniform(key, (2, 4, 16, 16), minval=-1.0, maxval=1.0)
    x = (x_fp * FX_ONE).astype(jnp.int32)            # fx_from_fp

    # ---- rate = 0.5 (rate_fx = 512, power of two -> remainder is always 0) ------
    rate_fx = int(0.5 * FX_ONE)
    out = jax.block_until_ready(dropout_forward(x, rate_fx, seed=1234, is_t=True))
    assert out.shape == x.shape and out.dtype == jnp.int32
    assert bool(jnp.all((out == 0) | (out == 2 * x))), "fx dropout semantics violated"
    kept = float(jnp.mean(((out != 0) | (x == 0)).astype(jnp.float32)))
    assert 0.35 < kept < 0.65, f"keep fraction {kept} far from 0.5"

    # ---- rate = 0.3 (rate_fx = 307) exercises the exact-division + rounding path -
    rate2 = int(0.3 * FX_ONE)
    out2 = jax.block_until_ready(dropout_forward(x, rate2, seed=99, is_t=True))
    a = np.asarray(x, dtype=np.int64) * FX_ONE
    fl = np.floor_divide(a, rate2)
    o2 = np.asarray(out2, dtype=np.int64)
    assert bool(np.all((o2 == 0) | (o2 == fl) | (o2 == fl + 1))), "fx_div mismatch"

    # ---- eval mode is a pass-through --------------------------------------------
    out_eval = dropout_forward(x, rate_fx, seed=1234, is_t=False)
    assert bool(jnp.all(out_eval == x))

    print("KERNEL_OK")
</pallas_src>

<mosaic_0001>
module attributes {stable_mosaic.version = 11 : i64} {
  func.func @kernel(%arg0: i32, %arg1: memref<1xi32, #tpu.memory_space<smem>>, %arg2: memref<1x2048xi32, #tpu.memory_space<vmem>>, %arg3: memref<1x2048xi32, #tpu.memory_space<vmem>>) attributes {dimension_semantics = [#tpu.dimension_semantics<parallel>], iteration_bounds = array<i64: 1>, scalar_prefetch = 1 : i64, scratch_operands = 0 : i64, tpu.core_type = #tpu.core_type<tc>, window_params = [{transform_indices = @transform_0, window_bounds = array<i64: 1, 2048>}, {transform_indices = @transform_1, window_bounds = array<i64: 1, 2048>}]} {
    %c0 = arith.constant 0 : index
    %c0_0 = arith.constant 0 : index
    %0 = vector.load %arg2[%c0, %c0_0] : memref<1x2048xi32, #tpu.memory_space<vmem>>, vector<1x2048xi32>
    %1 = tpu.iota {dimensions = array<i32: 0>} : vector<1x2048xi32>
    %2 = tpu.iota {dimensions = array<i32: 1>} : vector<1x2048xi32>
    %c2048_i32 = arith.constant 2048 : i32
    %3 = arith.muli %arg0, %c2048_i32 : i32
    %c2048_i32_1 = arith.constant 2048 : i32
    %4 = vector.broadcast %c2048_i32_1 : i32 to vector<1x2048xi32>
    %5 = arith.muli %1, %4 : vector<1x2048xi32>
    %6 = vector.broadcast %3 : i32 to vector<1x2048xi32>
    %7 = arith.addi %6, %5 : vector<1x2048xi32>
    %8 = arith.addi %7, %2 : vector<1x2048xi32>
    %c-1640531527_i32 = arith.constant -1640531527 : i32
    %9 = vector.broadcast %c-1640531527_i32 : i32 to vector<1x2048xi32>
    %10 = arith.muli %8, %9 : vector<1x2048xi32>
    %c0_2 = arith.constant 0 : index
    %11 = memref.load %arg1[%c0_2] : memref<1xi32, #tpu.memory_space<smem>>
    %12 = vector.broadcast %11 : i32 to vector<1x2048xi32>
    %13 = arith.addi %10, %12 : vector<1x2048xi32>
    %c16_i32 = arith.constant 16 : i32
    %14 = vector.broadcast %c16_i32 : i32 to vector<1x2048xi32>
    %15 = arith.shrsi %13, %14 : vector<1x2048xi32>
    %c65535_i32 = arith.constant 65535 : i32
    %16 = vector.broadcast %c65535_i32 : i32 to vector<1x2048xi32>
    %17 = arith.andi %15, %16 : vector<1x2048xi32>
    %18 = arith.xori %13, %17 : vector<1x2048xi32>
    %c-2048144789_i32 = arith.constant -2048144789 : i32
    %19 = vector.broadcast %c-2048144789_i32 : i32 to vector<1x2048xi32>
    %20 = arith.muli %18, %19 : vector<1x2048xi32>
    %c13_i32 = arith.constant 13 : i32
    %21 = vector.broadcast %c13_i32 : i32 to vector<1x2048xi32>
    %22 = arith.shrsi %20, %21 : vector<1x2048xi32>
    %c524287_i32 = arith.constant 524287 : i32
    %23 = vector.broadcast %c524287_i32 : i32 to vector<1x2048xi32>
    %24 = arith.andi %22, %23 : vector<1x2048xi32>
    %25 = arith.xori %20, %24 : vector<1x2048xi32>
    %c-1028477387_i32 = arith.constant -1028477387 : i32
    %26 = vector.broadcast %c-1028477387_i32 : i32 to vector<1x2048xi32>
    %27 = arith.muli %25, %26 : vector<1x2048xi32>
    %c16_i32_3 = arith.constant 16 : i32
    %28 = vector.broadcast %c16_i32_3 : i32 to vector<1x2048xi32>
    %29 = arith.shrsi %27, %28 : vector<1x2048xi32>
    %c65535_i32_4 = arith.constant 65535 : i32
    %30 = vector.broadcast %c65535_i32_4 : i32 to vector<1x2048xi32>
    %31 = arith.andi %29, %30 : vector<1x2048xi32>
    %32 = arith.xori %27, %31 : vector<1x2048xi32>
    %c1023_i32 = arith.constant 1023 : i32
    %33 = vector.broadcast %c1023_i32 : i32 to vector<1x2048xi32>
    %34 = arith.andi %32, %33 : vector<1x2048xi32>
    %c512_i32 = arith.constant 512 : i32
    %35 = vector.broadcast %c512_i32 : i32 to vector<1x2048xi32>
    %36 = arith.cmpi sge, %34, %35 : vector<1x2048xi32>
    %c10_i32 = arith.constant 10 : i32
    %37 = vector.broadcast %c10_i32 : i32 to vector<1x2048xi32>
    %38 = arith.shrsi %32, %37 : vector<1x2048xi32>
    %c4194303_i32 = arith.constant 4194303 : i32
    %39 = vector.broadcast %c4194303_i32 : i32 to vector<1x2048xi32>
    %40 = arith.andi %38, %39 : vector<1x2048xi32>
    %c11_i32 = arith.constant 11 : i32
    %41 = vector.broadcast %c11_i32 : i32 to vector<1x2048xi32>
    %42 = arith.shrsi %0, %41 : vector<1x2048xi32>
    %c11_i32_5 = arith.constant 11 : i32
    %43 = vector.broadcast %c11_i32_5 : i32 to vector<1x2048xi32>
    %44 = arith.shli %42, %43 : vector<1x2048xi32>
    %45 = arith.subi %0, %44 : vector<1x2048xi32>
    %c0_i32 = arith.constant 0 : i32
    %46 = vector.broadcast %c0_i32 : i32 to vector<1x2048xi32>
    %47 = arith.muli %42, %46 : vector<1x2048xi32>
    %c10_i32_6 = arith.constant 10 : i32
    %48 = vector.broadcast %c10_i32_6 : i32 to vector<1x2048xi32>
    %49 = arith.shli %45, %48 : vector<1x2048xi32>
    %50 = arith.addi %47, %49 : vector<1x2048xi32>
    %c524288_i32 = arith.constant 524288 : i32
    %51 = vector.broadcast %c524288_i32 : i32 to vector<1x2048xi32>
    %52 = arith.addi %50, %51 : vector<1x2048xi32>
    %53 = arith.sitofp %52 : vector<1x2048xi32> to vector<1x2048xf32>
    %cst = arith.constant 0.001953125 : f32
    %54 = vector.broadcast %cst : f32 to vector<1x2048xf32>
    %55 = arith.mulf %53, %54 : vector<1x2048xf32>
    %56 = arith.fptosi %55 : vector<1x2048xf32> to vector<1x2048xi32>
    %c512_i32_7 = arith.constant 512 : i32
    %57 = vector.broadcast %c512_i32_7 : i32 to vector<1x2048xi32>
    %58 = arith.muli %56, %57 : vector<1x2048xi32>
    %59 = arith.subi %52, %58 : vector<1x2048xi32>
    %c512_i32_8 = arith.constant 512 : i32
    %60 = vector.broadcast %c512_i32_8 : i32 to vector<1x2048xi32>
    %61 = arith.cmpi sge, %59, %60 : vector<1x2048xi32>
    %62 = arith.extui %61 : vector<1x2048xi1> to vector<1x2048xi32>
    %63 = arith.addi %56, %62 : vector<1x2048xi32>
    %c0_i32_9 = arith.constant 0 : i32
    %64 = vector.broadcast %c0_i32_9 : i32 to vector<1x2048xi32>
    %65 = arith.cmpi slt, %59, %64 : vector<1x2048xi32>
    %66 = arith.extui %65 : vector<1x2048xi1> to vector<1x2048xi32>
    %67 = arith.subi %63, %66 : vector<1x2048xi32>
    %c512_i32_10 = arith.constant 512 : i32
    %68 = vector.broadcast %c512_i32_10 : i32 to vector<1x2048xi32>
    %69 = arith.muli %67, %68 : vector<1x2048xi32>
    %70 = arith.subi %52, %69 : vector<1x2048xi32>
    %c4096_i32 = arith.constant 4096 : i32
    %71 = vector.broadcast %c4096_i32 : i32 to vector<1x2048xi32>
    %72 = arith.muli %42, %71 : vector<1x2048xi32>
    %c1024_i32 = arith.constant 1024 : i32
    %73 = vector.broadcast %c1024_i32 : i32 to vector<1x2048xi32>
    %74 = arith.subi %67, %73 : vector<1x2048xi32>
    %75 = arith.addi %72, %74 : vector<1x2048xi32>
    %c8192_i32 = arith.constant 8192 : i32
    %76 = vector.broadcast %c8192_i32 : i32 to vector<1x2048xi32>
    %77 = arith.muli %70, %76 : vector<1x2048xi32>
    %78 = arith.cmpi slt, %40, %77 : vector<1x2048xi32>
    %79 = arith.extui %78 : vector<1x2048xi1> to vector<1x2048xi32>
    %80 = arith.addi %75, %79 : vector<1x2048xi32>
    %c0_i32_11 = arith.constant 0 : i32
    %81 = vector.broadcast %c0_i32_11 : i32 to vector<1x2048xi32>
    %82 = arith.select %36, %80, %81 : vector<1x2048xi1>, vector<1x2048xi32>
    %c0_12 = arith.constant 0 : index
    %c0_13 = arith.constant 0 : index
    %83 = vector.load %arg3[%c0_12, %c0_13] : memref<1x2048xi32, #tpu.memory_space<vmem>>, vector<1x2048xi32>
    tpu.vector_store %arg3[%c0_12, %c0_13], %82 {strides = array<i32>} : memref<1x2048xi32, #tpu.memory_space<vmem>>, vector<1x2048xi32>,
    return
  }
  func.func @transform_0(%arg0: i32, %arg1: memref<1xi32, #tpu.memory_space<smem>>) -> (i32, i32) {
    %c0_i32 = arith.constant 0 : i32
    %c0_i32_0 = arith.constant 0 : i32
    return %arg0, %c0_i32 : i32, i32
  }
  func.func @transform_1(%arg0: i32, %arg1: memref<1xi32, #tpu.memory_space<smem>>) -> (i32, i32) {
    %c0_i32 = arith.constant 0 : i32
    %c0_i32_0 = arith.constant 0 : i32
    return %arg0, %c0_i32 : i32, i32
  }
}

</mosaic_0001>

<bundles_post_ra>
// kernel: tpu_custom_call.1
= control target key start
LH: loop header
LB: loop body
LE: loop exit
PB: predicated region body
PF: predicated region fallthrough
CT: control target
= control target key end

     0   :  { %8 = vsyncpa [#allocation5], 0  ;;  %s1131_s0 = inlined_call_operand.<no memory space> [shape: s32[1], index: 0, kind: input, shape index: {}]   ;;  %s1132_s1 = inlined_call_operand.hbm [shape: s32[1,2048], index: 1, kind: input, shape index: {}, may-alias: {1,2}]   ;;  %s1133_s2 = inlined_call_operand.hbm [shape: s32[1,2048], index: 2, kind: output, shape index: {}, may-alias: {1,2}]  }
   0x1   :  { %9 = vsyncpa [#allocation6], 0  ;;  %s15_s11 = sshll.u32 %s1132_s1, 4  ;;  %s679_s12 = smov [#allocation4]   ;;  %s16_s11 = int_to_ptr.hbm [resolvable:$true] %s15_s11 }
   0x2   :  { %s17_s13 = sshll.u32 %s679_s12, 4  ;;  %s18_s13 = int_to_ptr.vmem [resolvable:$true] %s17_s13 }
   0x3   :  { %20 = dma.hbm_to_vmem [thread:$0]  %s16_s11, 256, %s18_s13, [#allocation5]  }
   0x4   :  { %675 = dma.done.wait [#allocation5], 256  }
   0x5   :  { %676 = vsyncadd [#allocation5], 4294967040  ;;  %v27_v0 = vlaneseq  ;;  %v703_v5 = vstv %s1131_s0  ;;  %v705_v10 = vld [vmem:[#allocation4] sm:$0xff]  ;;  %v707_v15 = vld [vmem:[#allocation4 + $0x8] sm:$0xff]  ;;  %vm456_vm10 = vcmask 1045508   ;;  %s681_s0 = smov [#allocation7]  }
   0x6   :  { %v340_v27 = vshra.s32 %v705_v10, 11  ;;  %v341_v31 = vshra.s32 %v707_v15, 11  ;;  %s536_s1 = sshll.u32 %s681_s0, 4  ;;  %s538_s18 = sshll.u32 %s1133_s2, 4  ;;  %s537_s1 = int_to_ptr.vmem [resolvable:$true] %s536_s1  ;;  %s539_s18 = int_to_ptr.hbm [resolvable:$true] %s538_s18 }
   0x7   :  { %v28_v1 = vshrl.u32 %v27_v0, 7  ;;  %v30_v2 = vand.u32 127, %v27_v0 }
   0x9   :  { %v31_v3 = vadd.s32 128, %v30_v2  ;;  %v47_v4 = vmul.u32 2048, %v28_v1  ;;  %v32_v6 = vadd.s32 256, %v30_v2  ;;  %v33_v7 = vadd.s32 384, %v30_v2 }
   0xa   :  { %v34_v8 = vadd.s32 512, %v30_v2  ;;  %v35_v9 = vadd.s32 640, %v30_v2  ;;  %v36_v11 = vadd.s32 768, %v30_v2  ;;  %v37_v12 = vadd.s32 896, %v30_v2 }
   0xb   :  { %v38_v13 = vadd.s32 1024, %v30_v2  ;;  %v39_v14 = vadd.s32 1152, %v30_v2  ;;  %v40_v16 = vadd.s32 1280, %v30_v2  ;;  %v41_v17 = vadd.s32 1408, %v30_v2 }
   0xc   :  { %v42_v18 = vadd.s32 1536, %v30_v2  ;;  %v43_v19 = vadd.s32 1664, %v30_v2  ;;  %v44_v20 = vadd.s32 1792, %v30_v2  ;;  %v45_v21 = vadd.s32 1920, %v30_v2 }
   0xd   :  { %v50_v22 = vadd.s32 %v47_v4, %v30_v2  ;;  %v51_v23 = vadd.s32 %v47_v4, %v31_v3  ;;  %v52_v24 = vadd.s32 %v47_v4, %v32_v6  ;;  %v53_v25 = vadd.s32 %v47_v4, %v33_v7 }
   0xe   :  { %v54_v26 = vadd.s32 %v47_v4, %v34_v8  ;;  %v55_v28 = vadd.s32 %v47_v4, %v35_v9  ;;  %v56_v29 = vadd.s32 %v47_v4, %v36_v11  ;;  %v57_v30 = vadd.s32 %v47_v4, %v37_v12 }
   0xf   :  { %v58_v32 = vadd.s32 %v47_v4, %v38_v13  ;;  %v59_v33 = vadd.s32 %v47_v4, %v39_v14  ;;  %v60_v34 = vadd.s32 %v47_v4, %v40_v16  ;;  %v61_v35 = vadd.s32 %v47_v4, %v41_v17 }
  0x10   :  { %v62_v36 = vadd.s32 %v47_v4, %v42_v18  ;;  %v63_v37 = vadd.s32 %v47_v4, %v43_v19  ;;  %v66_v38 = vmul.u32 2654435769, %v50_v22  ;;  %v67_v39 = vmul.u32 2654435769, %v51_v23 }
  0x11   :  { %v64_v40 = vadd.s32 %v47_v4, %v44_v20  ;;  %v68_v41 = vmul.u32 2654435769, %v52_v24  ;;  %v69_v42 = vmul.u32 2654435769, %v53_v25  ;;  %v70_v43 = vmul.u32 2654435769, %v54_v26 }
  0x12   :  { %v65_v44 = vadd.s32 %v47_v4, %v45_v21  ;;  %v71_v45 = vmul.u32 2654435769, %v55_v28  ;;  %v72_v46 = vmul.u32 2654435769, %v56_v29  ;;  %v73_v47 = vmul.u32 2654435769, %v57_v30 }
  0x13   :  { %v74_v48 = vmul.u32 2654435769, %v58_v32  ;;  %v75_v49 = vmul.u32 2654435769, %v59_v33  ;;  %v76_v50 = vmul.u32 2654435769, %v60_v34  ;;  %v84_v54 = vadd.s32 %v703_v5, %v66_v38 }
  0x14   :  { %v77_v51 = vmul.u32 2654435769, %v61_v35  ;;  %v78_v52 = vmul.u32 2654435769, %v62_v36  ;;  %v79_v53 = vmul.u32 2654435769, %v63_v37  ;;  %v85_v56 = vadd.s32 %v703_v5, %v67_v39 }
  0x15   :  { %v80_v55 = vmul.u32 2654435769, %v64_v40  ;;  %v86_v57 = vadd.s32 %v703_v5, %v68_v41  ;;  %v87_v58 = vadd.s32 %v703_v5, %v69_v42  ;;  %v81_v59 = vmul.u32 2654435769, %v65_v44 }
  0x16   :  { %v88_v60 = vadd.s32 %v703_v5, %v70_v43  ;;  %v89_v61 = vadd.s32 %v703_v5, %v71_v45  ;;  %v90_v62 = vadd.s32 %v703_v5, %v72_v46  ;;  %v91_v63 = vadd.s32 %v703_v5, %v73_v47 }
  0x17   :  { %v92_v0 = vadd.s32 %v703_v5, %v74_v48  ;;  %v93_v1 = vadd.s32 %v703_v5, %v75_v49  ;;  %v94_v2 = vadd.s32 %v703_v5, %v76_v50  ;;  %v95_v3 = vadd.s32 %v703_v5, %v77_v51 }
  0x18   :  { %v96_v4 = vadd.s32 %v703_v5, %v78_v52  ;;  %v97_v6 = vadd.s32 %v703_v5, %v79_v53  ;;  %v548_v7 = vshrl.u32 %v84_v54, 16  ;;  %v98_v8 = vadd.s32 %v703_v5, %v80_v55 }
  0x19   :  { %v549_v9 = vshrl.u32 %v85_v56, 16  ;;  %v550_v11 = vshrl.u32 %v86_v57, 16  ;;  %v551_v12 = vshrl.u32 %v87_v58, 16  ;;  %v99_v13 = vadd.s32 %v703_v5, %v81_v59 }
  0x1a   :  { %v552_v14 = vshrl.u32 %v88_v60, 16  ;;  %v553_v16 = vshrl.u32 %v89_v61, 16  ;;  %v554_v17 = vshrl.u32 %v90_v62, 16  ;;  %v555_v18 = vshrl.u32 %v91_v63, 16 }
  0x1b   :  { %v556_v19 = vshrl.u32 %v92_v0, 16  ;;  %v557_v20 = vshrl.u32 %v93_v1, 16  ;;  %v558_v21 = vshrl.u32 %v94_v2, 16  ;;  %v559_v22 = vshrl.u32 %v95_v3, 16 }
  0x1c   :  { %v560_v23 = vshrl.u32 %v96_v4, 16  ;;  %v561_v24 = vshrl.u32 %v97_v6, 16  ;;  %v132_v25 = vxor.u32 %v548_v7, %v84_v54  ;;  %v562_v26 = vshrl.u32 %v98_v8, 16 }
  0x1d   :  { %v133_v28 = vxor.u32 %v549_v9, %v85_v56  ;;  %v134_v29 = vxor.u32 %v550_v11, %v86_v57  ;;  %v135_v30 = vxor.u32 %v551_v12, %v87_v58  ;;  %v563_v32 = vshrl.u32 %v99_v13, 16 }
  0x1e   :  { %v136_v33 = vxor.u32 %v552_v14, %v88_v60  ;;  %v137_v34 = vxor.u32 %v553_v16, %v89_v61  ;;  %v138_v35 = vxor.u32 %v554_v17, %v90_v62  ;;  %v139_v5 = vxor.u32 %v555_v18, %v91_v63 }
  0x1f   :  { %v140_v36 = vxor.u32 %v556_v19, %v92_v0  ;;  %v141_v37 = vxor.u32 %v557_v20, %v93_v1  ;;  %v142_v38 = vxor.u32 %v558_v21, %v94_v2  ;;  %v143_v39 = vxor.u32 %v559_v22, %v95_v3 }
  0x20   :  { %v144_v40 = vxor.u32 %v560_v23, %v96_v4  ;;  %v145_v41 = vxor.u32 %v561_v24, %v97_v6  ;;  %v148_v42 = vmul.u32 2246822507, %v132_v25  ;;  %v146_v43 = vxor.u32 %v562_v26, %v98_v8 }
  0x21   :  { %v149_v44 = vmul.u32 2246822507, %v133_v28  ;;  %v150_v45 = vmul.u32 2246822507, %v134_v29  ;;  %v151_v46 = vmul.u32 2246822507, %v135_v30  ;;  %v147_v47 = vxor.u32 %v563_v32, %v99_v13 }
  0x22   :  { %v152_v48 = vmul.u32 2246822507, %v136_v33  ;;  %v153_v49 = vmul.u32 2246822507, %v137_v34  ;;  %v154_v50 = vmul.u32 2246822507, %v138_v35 }
  0x23   :  { %v155_v51 = vmul.u32 2246822507, %v139_v5  ;;  %v156_v52 = vmul.u32 2246822507, %v140_v36  ;;  %v157_v53 = vmul.u32 2246822507, %v141_v37 }
  0x24   :  { %v158_v54 = vmul.u32 2246822507, %v142_v38  ;;  %v159_v55 = vmul.u32 2246822507, %v143_v39  ;;  %v160_v56 = vmul.u32 2246822507, %v144_v40 }
  0x25   :  { %v161_v57 = vmul.u32 2246822507, %v145_v41  ;;  %v162_v58 = vmul.u32 2246822507, %v146_v43  ;;  %v564_v59 = vshrl.u32 %v148_v42, 13  ;;  %v565_v60 = vshrl.u32 %v149_v44, 13 }
  0x26   :  { %v163_v61 = vmul.u32 2246822507, %v147_v47  ;;  %v566_v62 = vshrl.u32 %v150_v45, 13  ;;  %v567_v63 = vshrl.u32 %v151_v46, 13  ;;  %v568_v0 = vshrl.u32 %v152_v48, 13 }
  0x27   :  { %v569_v1 = vshrl.u32 %v153_v49, 13  ;;  %v570_v2 = vshrl.u32 %v154_v50, 13  ;;  %v571_v3 = vshrl.u32 %v155_v51, 13  ;;  %v572_v4 = vshrl.u32 %v156_v52, 13 }
  0x28   :  { %v573_v6 = vshrl.u32 %v157_v53, 13  ;;  %v574_v7 = vshrl.u32 %v158_v54, 13  ;;  %v575_v8 = vshrl.u32 %v159_v55, 13  ;;  %v576_v9 = vshrl.u32 %v160_v56, 13 }
  0x29   :  { %v577_v11 = vshrl.u32 %v161_v57, 13  ;;  %v578_v12 = vshrl.u32 %v162_v58, 13  ;;  %v196_v13 = vxor.u32 %v564_v59, %v148_v42  ;;  %v197_v14 = vxor.u32 %v565_v60, %v149_v44 }
  0x2a   :  { %v579_v16 = vshrl.u32 %v163_v61, 13  ;;  %v198_v17 = vxor.u32 %v566_v62, %v150_v45  ;;  %v727_v18 = vxor.u32 %v567_v63, %v151_v46  ;;  %v729_v19 = vxor.u32 %v568_v0, %v152_v48 }
  0x2b   :  { %v731_v20 = vxor.u32 %v569_v1, %v153_v49  ;;  %v733_v21 = vxor.u32 %v570_v2, %v154_v50  ;;  %v735_v22 = vxor.u32 %v571_v3, %v155_v51  ;;  %v737_v23 = vxor.u32 %v572_v4, %v156_v52 }
  0x2c   :  { %v739_v24 = vxor.u32 %v573_v6, %v157_v53  ;;  %v741_v25 = vxor.u32 %v574_v7, %v158_v54  ;;  %v743_v26 = vxor.u32 %v575_v8, %v159_v55  ;;  %v745_v28 = vxor.u32 %v576_v9, %v160_v56 }
  0x2d   :  { %v747_v29 = vxor.u32 %v577_v11, %v161_v57  ;;  %v749_v30 = vxor.u32 %v578_v12, %v162_v58  ;;  %v212_v32 = vmul.u32 3266489909, %v196_v13  ;;  %v213_v33 = vmul.u32 3266489909, %v197_v14 }
  0x2e   :  { %v214_v34 = vmul.u32 3266489909, %v198_v17  ;;  %v215_v35 = vmul.u32 3266489909, %v727_v18  ;;  %v342_v5 = vshll.u32 %v340_v27, 11  ;;  %v343_v36 = vshll.u32 %v341_v31, 11 }
  0x2f   :  { %v756_v37 = vxor.u32 %v579_v16, %v163_v61  ;;  %v216_v38 = vmul.u32 3266489909, %v729_v19  ;;  %v217_v39 = vmul.u32 3266489909, %v731_v20  ;;  %v218_v40 = vmul.u32 3266489909, %v733_v21 }
  0x30   :  { %v219_v41 = vmul.u32 3266489909, %v735_v22  ;;  %v220_v42 = vmul.u32 3266489909, %v737_v23  ;;  %v344_v43 = vsub.s32 %v705_v10, %v342_v5  ;;  %v345_v44 = vsub.s32 %v707_v15, %v343_v36 }
  0x31   :  { %v221_v45 = vmul.u32 3266489909, %v739_v24  ;;  %v222_v46 = vmul.u32 3266489909, %v741_v25  ;;  %v223_v47 = vmul.u32 3266489909, %v743_v26 }
  0x32   :  { %v224_v48 = vmul.u32 3266489909, %v745_v28  ;;  %v225_v49 = vmul.u32 3266489909, %v747_v29  ;;  %v346_v50 = vshll.u32 %v344_v43, 10  ;;  %v347_v51 = vshll.u32 %v345_v44, 10 }
  0x33   :  { %v226_v52 = vmul.u32 3266489909, %v749_v30  ;;  %v227_v53 = vmul.u32 3266489909, %v756_v37  ;;  %v580_v54 = vshrl.u32 %v212_v32, 16  ;;  %v581_v55 = vshrl.u32 %v213_v33, 16 }
  0x34   :  { %v582_v56 = vshrl.u32 %v214_v34, 16  ;;  %v772_v57 = vadd.s32 524288, %v346_v50  ;;  %v774_v58 = vadd.s32 524288, %v347_v51  ;;  %v583_v59 = vshrl.u32 %v215_v35, 16 }
  0x35   :  { %v584_v60 = vshrl.u32 %v216_v38, 16  ;;  %v585_v61 = vshrl.u32 %v217_v39, 16  ;;  %v586_v62 = vshrl.u32 %v218_v40, 16  ;;  %v587_v63 = vshrl.u32 %v219_v41, 16 }
  0x36   :  { %v588_v0 = vshrl.u32 %v220_v42, 16  ;;  %v350_v1 = vcvt.s32.f32 %v772_v57  ;;  %v351_v2 = vcvt.s32.f32 %v774_v58  ;;  %v589_v3 = vshrl.u32 %v221_v45, 16 }
  0x37   :  { %v590_v4 = vshrl.u32 %v222_v46, 16  ;;  %v591_v6 = vshrl.u32 %v223_v47, 16  ;;  %v592_v7 = vshrl.u32 %v224_v48, 16  ;;  %v593_v8 = vshrl.u32 %v225_v49, 16 }
  0x38   :  { %v594_v9 = vshrl.u32 %v226_v52, 16  ;;  %v352_v11 = vmul.f32 0.001953125, %v350_v1  ;;  %v353_v12 = vmul.f32 0.001953125, %v351_v2  ;;  %v595_v13 = vshrl.u32 %v227_v53, 16 }
  0x39   :  { %v778_v14 = vxor.u32 %v580_v54, %v212_v32  ;;  %v780_v16 = vxor.u32 %v581_v55, %v213_v33  ;;  %v782_v17 = vxor.u32 %v582_v56, %v214_v34  ;;  %v784_v20 = vxor.u32 %v583_v59, %v215_v35 }
  0x3a   :  { %vm614_vm0 = vcmp.lt.s32.totalorder %v352_v11, 0  ;;  %v615_v18 = vceil.f32 %v352_v11  ;;  %v616_v19 = vfloor.f32 %v352_v11  ;;  %vm619_vm1 = vcmp.lt.s32.totalorder %v353_v12, 0 }
  0x3b   :  { %v786_v21 = vxor.u32 %v584_v60, %v216_v38  ;;  %v620_v22 = vceil.f32 %v353_v12  ;;  %v621_v23 = vfloor.f32 %v353_v12  ;;  %v788_v24 = vxor.u32 %v585_v61, %v217_v39 }
  0x3c   :  { %v790_v25 = vxor.u32 %v586_v62, %v218_v40  ;;  %v792_v26 = vxor.u32 %v587_v63, %v219_v41  ;;  %v617_v28 = vsel %vm614_vm0, %v615_v18, %v616_v19  ;;  %v794_v29 = vxor.u32 %v588_v0, %v220_v42 }
  0x3d   :  { %v796_v30 = vxor.u32 %v589_v3, %v221_v45  ;;  %v618_v32 = vcvt.f32.s32 %v617_v28  ;;  %v622_v33 = vsel %vm619_vm1, %v620_v22, %v621_v23  ;;  %v798_v34 = vxor.u32 %v590_v4, %v222_v46 }
  0x3e   :  { %v800_v35 = vxor.u32 %v591_v6, %v223_v47  ;;  %v802_v5 = vxor.u32 %v592_v7, %v224_v48  ;;  %v623_v36 = vcvt.f32.s32 %v622_v33  ;;  %v804_v37 = vxor.u32 %v593_v8, %v225_v49 }
  0x3f   :  { %v806_v38 = vxor.u32 %v594_v9, %v226_v52  ;;  %v808_v39 = vxor.u32 %v595_v13, %v227_v53  ;;  %v356_v40 = vmul.u32 512, %v618_v32  ;;  %v276_v41 = vand.u32 1023, %v778_v14 }
  0x40   :  { %v277_v42 = vand.u32 1023, %v780_v16  ;;  %v278_v43 = vand.u32 1023, %v782_v17  ;;  %v357_v44 = vmul.u32 512, %v623_v36  ;;  %v279_v45 = vand.u32 1023, %v784_v20 }
  0x41   :  { %v280_v46 = vand.u32 1023, %v786_v21  ;;  %v358_v47 = vsub.s32 %v772_v57, %v356_v40  ;;  %v281_v48 = vand.u32 1023, %v788_v24  ;;  %v282_v49 = vand.u32 1023, %v790_v25 }
  0x42   :  { %v359_v51 = vsub.s32 %v774_v58, %v357_v44  ;;  %v680_v54 = vmov 0   ;;  %v596_v6 = vshrl.u32 %v778_v14, 10  ;;  %v597_v8 = vshrl.u32 %v780_v16, 10 }
  0x43   :  { %vm360_vm2 = vcmp.ge.s32.totalorder %v358_v47, 512  ;;  %vm366_vm3 = vcmp.lt.s32.totalorder %v358_v47, 0  ;;  %v598_v9 = vshrl.u32 %v782_v17, 10  ;;  %v599_v11 = vshrl.u32 %v784_v20, 10 }
  0x44   :  { %vm361_vm4 = vcmp.ge.s32.totalorder %v359_v51, 512  ;;  %v362_v55 = vsel %vm360_vm2, 1, %v680_v54  ;;  %vm367_vm5 = vcmp.lt.s32.totalorder %v359_v51, 0  ;;  %v368_v56 = vsel %vm366_vm3, 1, %v680_v54 }
  0x45   :  { %v363_v60 = vsel %vm361_vm4, 1, %v680_v54  ;;  %v364_v61 = vadd.s32 %v618_v32, %v362_v55  ;;  %v369_v62 = vsel %vm367_vm5, 1, %v680_v54  ;;  %v600_v13 = vshrl.u32 %v786_v21, 10 }
  0x46   :  { %v365_v2 = vadd.s32 %v623_v36, %v363_v60  ;;  %v601_v18 = vshrl.u32 %v788_v24, 10  ;;  %v376_v22 = vmul.u32 4096, %v340_v27  ;;  %v377_v28 = vmul.u32 4096, %v341_v31 }
  0x47   :  { %v370_v7 = vsub.s32 %v364_v61, %v368_v56  ;;  %v602_v36 = vshrl.u32 %v790_v25, 10  ;;  %v603_v40 = vshrl.u32 %v792_v26, 10  ;;  %v604_v44 = vshrl.u32 %v794_v29, 10 }
  0x48   :  { %v371_v12 = vsub.s32 %v365_v2, %v369_v62  ;;  %v605_v51 = vshrl.u32 %v796_v30, 10  ;;  %v606_v55 = vshrl.u32 %v798_v34, 10  ;;  %v607_v10 = vshrl.u32 %v800_v35, 10 }
  0x49   :  { %v372_v19 = vmul.u32 512, %v370_v7  ;;  %v612_v32 = vadd.s32 4294966272, %v370_v7  ;;  %v608_v15 = vshrl.u32 %v802_v5, 10  ;;  %v609_v31 = vshrl.u32 %v804_v37, 10 }
  0x4a   :  { %v373_v23 = vmul.u32 512, %v371_v12  ;;  %v613_v33 = vadd.s32 4294966272, %v371_v12  ;;  %v610_v56 = vshrl.u32 %v806_v38, 10  ;;  %v611_v61 = vshrl.u32 %v808_v39, 10 }
  0x4b   :  { %v374_v47 = vsub.s32 %v772_v57, %v372_v19  ;;  %v854_v62 = vadd.s32 %v612_v32, %v376_v22  ;;  %v1180_v20 = vmov 0  ;;  %v1183_v21 = vmov 0 }
  0x4c   :  { %v375_v27 = vsub.s32 %v774_v58, %v373_v23  ;;  %v856_v57 = vadd.s32 %v613_v33, %v377_v28  ;;  %v1188_v25 = vmov 0 }
  0x4d   :  { %v382_v60 = vmul.u32 8192, %v374_v47 }
  0x4e   :  { %v383_v2 = vmul.u32 8192, %v375_v27 }
  0x4f   :  { %v384_v7 = vperm.slane %v382_v60, 0  ;;  %v385_v12 = vperm.slane %v382_v60, 1  ;;  %v386_v19 = vperm.slane %v382_v60, 2  ;;  %v387_v4 = vperm.slane %v382_v60, 3 }
  0x50   :  { %v388_v3 = vperm.slane %v382_v60, 4  ;;  %v389_v58 = vperm.slane %v382_v60, 5  ;;  %v390_v23 = vperm.slane %v382_v60, 6  ;;  %v391_v1 = vperm.slane %v382_v60, 7 }
  0x51   :  { %v392_v0 = vperm.slane %v383_v2, 0  ;;  %v393_v63 = vperm.slane %v383_v2, 1  ;;  %v394_v59 = vperm.slane %v383_v2, 2  ;;  %v395_v53 = vperm.slane %v383_v2, 3 }
  0x52   :  { %v396_v47 = vperm.slane %v383_v2, 4  ;;  %v397_v52 = vperm.slane %v383_v2, 5  ;;  %v398_v50 = vperm.slane %v383_v2, 6  ;;  %v399_v22 = vperm.slane %v383_v2, 7 }
  0x53   :  { %vm858_vm6 = vcmp.lt.s32.totalorder %v596_v6, %v384_v7  ;;  %vm862_vm7 = vcmp.lt.s32.totalorder %v597_v8, %v385_v12  ;;  %vm866_vm8 = vcmp.lt.s32.totalorder %v598_v9, %v386_v19  ;;  %vm870_vm9 = vcmp.lt.s32.totalorder %v599_v11, %v387_v4 }
  0x54   :  { %vm874_vm12 = vcmp.lt.s32.totalorder %v600_v13, %v388_v3  ;;  %vm878_vm13 = vcmp.lt.s32.totalorder %v601_v18, %v389_v58  ;;  %vm882_vm14 = vcmp.lt.s32.totalorder %v602_v36, %v390_v23  ;;  %vm886_vm15 = vcmp.lt.s32.totalorder %v603_v40, %v391_v1 }
  0x55   :  { %vm890_vm3 = vcmp.lt.s32.totalorder %v604_v44, %v392_v0  ;;  %vm894_vm4 = vcmp.lt.s32.totalorder %v605_v51, %v393_v63  ;;  %v1152_v4 = vmov 0  ;;  %vm898_vm5 = vcmp.lt.s32.totalorder %v606_v55, %v394_v59 }
  0x56   :  { %v1153_v4 = vsel %vm894_vm4, 4294967295, %v1152_v4  ;;  %vm902_vm11 = vcmp.lt.s32.totalorder %v607_v10, %v395_v53  ;;  %vm906_vm0 = vcmp.lt.s32.totalorder %v608_v15, %v396_v47  ;;  %vm910_vm2 = vcmp.lt.s32.totalorder %v609_v31, %v397_v52 }
  0x57   :  { %vm914_vm1 = vcmp.lt.s32.totalorder %v610_v56, %v398_v50  ;;  %vm918_vm4 = vcmp.lt.s32.totalorder %v611_v61, %v399_v22  ;;  %v416_v53 = vsel %vm858_vm6, 1, %v680_v54  ;;  %v417_v52 = vsel %vm862_vm7, 1, %v680_v54  ;;  %vm1167_vm7 = vmmov %vm898_vm5 }
  0x58   :  { %v418_v50 = vsel %vm866_vm8, 1, %v680_v54  ;;  %v419_v18 = vsel %vm870_vm9, 1, %v680_v54  ;;  %v420_v36 = vsel %vm874_vm12, 1, %v680_v54  ;;  %v421_v40 = vsel %vm878_vm13, 1, %v680_v54 }
  0x59   :  { %v422_v44 = vsel %vm882_vm14, 1, %v680_v54  ;;  %v423_v51 = vsel %vm886_vm15, 1, %v680_v54  ;;  %v424_v55 = vsel %vm890_vm3, 1, %v680_v54  ;;  %vm1166_vm6 = vnez %v1153_v4 }
  0x5a   :  { %v425_v10 = vsel %vm1166_vm6, 1, %v680_v54  ;;  %v426_v15 = vsel %vm1167_vm7, 1, %v680_v54  ;;  %v427_v31 = vsel %vm902_vm11, 1, %v680_v54  ;;  %v428_v56 = vsel %vm906_vm0, 1, %v680_v54 }
  0x5b   :  { %v429_v61 = vsel %vm910_vm2, 1, %v680_v54  ;;  %v430_v2 = vsel %vm914_vm1, 1, %v680_v54  ;;  %v431_v7 = vsel %vm918_vm4, 1, %v680_v54  ;;  %v432_v12 = vrot.slane %v417_v52, 7 }
  0x5c   :  { %v433_v19 = vrot.slane %v418_v50, 6  ;;  %v434_v58 = vrot.slane %v419_v18, 5  ;;  %v435_v23 = vrot.slane %v420_v36, 4  ;;  %v436_v47 = vrot.slane %v421_v40, 3 }
  0x5d   :  { %v437_v22 = vrot.slane %v422_v44, 2  ;;  %v438_v28 = vrot.slane %v423_v51, 1  ;;  %v439_v32 = vrot.slane %v425_v10, 7  ;;  %vm972_vm8 = vcmp.ge.s32.totalorder %v276_v41, 512 }
  0x5e   :  { %vm978_vm9 = vcmp.ge.s32.totalorder %v277_v42, 512  ;;  %vm984_vm11 = vcmp.ge.s32.totalorder %v278_v43, 512  ;;  %vm990_vm12 = vcmp.ge.s32.totalorder %v279_v45, 512  ;;  %v440_v41 = vrot.slane %v426_v15, 6 }
  0x5f   :  { %v441_v60 = vrot.slane %v427_v31, 5  ;;  %v442_v6 = vrot.slane %v428_v56, 4  ;;  %v443_v16 = vrot.slane %v429_v61, 3  ;;  %vm996_vm13 = vcmp.ge.s32.totalorder %v280_v46, 512 }
  0x60   :  { %vm1002_vm14 = vcmp.ge.s32.totalorder %v281_v48, 512  ;;  %vm1008_vm15 = vcmp.ge.s32.totalorder %v282_v49, 512  ;;  %v1182_v43 = vand.u32 1023, %v792_v26  ;;  %v444_v45 = vrot.slane %v430_v2, 2 }
  0x61   :  { %v1181_v20 = vsel %vm1008_vm15, 4294967295, %v1180_v20  ;;  %v445_v46 = vrot.slane %v431_v7, 1  ;;  %vm1185_vm1 = vcmask 1040384   ;;  %vm1186_vm2 = vcmask 1042434  }
  0x62   :  { %vm1014_vm0 = vcmp.ge.s32.totalorder %v1182_v43, 512  ;;  %v447_v24 = vsel %vm1185_vm1, %v416_v53, %v432_v12  ;;  %v449_v48 = vsel %vm1186_vm2, %v433_v19, %v434_v58  ;;  %v1187_v8 = vand.u32 1023, %v794_v29 }
  0x63   :  { %v1184_v21 = vsel %vm1014_vm0, 4294967295, %v1183_v21  ;;  %v1190_v49 = vand.u32 1023, %v796_v30  ;;  %vm1193_vm6 = vcmask 1041408   ;;  %vm1194_vm7 = vcmask 1044484  }
  0x64   :  { %vm1022_vm3 = vcmp.ge.s32.totalorder %v1187_v8, 512  ;;  %v451_v9 = vsel %vm1193_vm6, %v447_v24, %v449_v48  ;;  %v453_v3 = vsel %vm1194_vm7, %v435_v23, %v436_v47  ;;  %vm1195_vm5 = vcmask 1046534   ;;  %vm1196_vm0 = vmmov %vm1194_vm7 }
  0x65   :  { %v1189_v25 = vsel %vm1022_vm3, 4294967295, %v1188_v25  ;;  %vm1028_vm4 = vcmp.ge.s32.totalorder %v1190_v49, 512  ;;  %v455_v4 = vsel %vm1195_vm5, %v437_v22, %v438_v28  ;;  %v460_v11 = vsel %vm1185_vm1, %v424_v55, %v439_v32  ;;  %vm1197_vm3 = vmmov %vm1195_vm5 }
  0x66   :  { %v457_v29 = vsel %vm456_vm10, %v453_v3, %v455_v4  ;;  %v461_v1 = vsel %vm1186_vm2, %v440_v41, %v441_v60  ;;  %v463_v13 = vsel %vm1196_vm0, %v442_v6, %v443_v16  ;;  %v464_v30 = vsel %vm1197_vm3, %v444_v45, %v445_v46 }
  0x67   :  { %v1198_v0 = vand.u32 1023, %v798_v34  ;;  %vm1201_vm6 = vcmask 1043456   ;;  %vm1202_vm7 = vcmask 1041408   ;;  %v465_v52 = vsel %vm456_vm10, %v463_v13, %v464_v30 }
  0x68   :  { %v459_v59 = vsel %vm1201_vm6, %v451_v9, %v457_v29  ;;  %v462_v53 = vsel %vm1202_vm7, %v460_v11, %v461_v1  ;;  %v1203_v50 = vand.u32 1023, %v800_v35  ;;  %v1206_v36 = vand.u32 1023, %v802_v5  ;;  %vm1209_vm3 = vmmov %vm1201_vm6 }
  0x69   :  { %vm1042_vm15 = vcmp.ge.s32.totalorder %v1198_v0, 512  ;;  %v466_v40 = vsel %vm1209_vm3, %v462_v53, %v465_v52  ;;  %v467_v44 = vadd.s32 %v459_v59, %v854_v62  ;;  %v1210_v51 = vand.u32 1023, %v804_v37 }
  0x6a   :  { %vm1051_vm5 = vcmp.ge.s32.totalorder %v1203_v50, 512  ;;  %vm1057_vm0 = vcmp.ge.s32.totalorder %v1206_v36, 512  ;;  %v1213_v35 = vand.u32 1023, %v806_v38  ;;  %v1216_v5 = vand.u32 1023, %v808_v39 }
  0x6b   :  { %vm1065_vm1 = vcmp.ge.s32.totalorder %v1210_v51, 512  ;;  %v468_v62 = vadd.s32 %v466_v40, %v856_v57  ;;  %v469_v31 = vperm.slane %v467_v44, 0  ;;  %v470_v37 = vperm.slane %v467_v44, 1 }
  0x6c   :  { %vm1071_vm2 = vcmp.ge.s32.totalorder %v1213_v35, 512  ;;  %vm1077_vm6 = vcmp.ge.s32.totalorder %v1216_v5, 512  ;;  %v471_v56 = vperm.slane %v467_v44, 2  ;;  %v472_v61 = vperm.slane %v467_v44, 3 }
  0x6d   :  { %v473_v2 = vperm.slane %v467_v44, 4  ;;  %v474_v7 = vperm.slane %v467_v44, 5  ;;  %v475_v12 = vperm.slane %v467_v44, 6  ;;  %v476_v38 = vperm.slane %v467_v44, 7 }
  0x6e   :  { %v477_v19 = vperm.slane %v468_v62, 0  ;;  %v478_v58 = vperm.slane %v468_v62, 1  ;;  %v479_v23 = vperm.slane %v468_v62, 2  ;;  %v480_v47 = vperm.slane %v468_v62, 3 }
  0x6f   :  { %v481_v22 = vperm.slane %v468_v62, 4  ;;  %v482_v39 = vperm.slane %v468_v62, 5  ;;  %v483_v28 = vperm.slane %v468_v62, 6  ;;  %v484_v32 = vperm.slane %v468_v62, 7 }
  0x70   :  { %v485_v41 = vsel %vm972_vm8, %v469_v31, 0  ;;  %v486_v57 = vsel %vm978_vm9, %v470_v37, 0  ;;  %v487_v60 = vsel %vm984_vm11, %v471_v56, 0  ;;  %v488_v6 = vsel %vm990_vm12, %v472_v61, 0 }
  0x71   :  { %v489_v16 = vsel %vm996_vm13, %v473_v2, 0  ;;  %v490_v43 = vsel %vm1002_vm14, %v474_v7, 0  ;;  %vm1219_vm7 = vnez %v1181_v20  ;;  %vm1220_vm8 = vnez %v1184_v21 }
  0x72   :  { %v491_v45 = vsel %vm1219_vm7, %v475_v12, 0  ;;  %v492_v33 = vsel %vm1220_vm8, %v476_v38, 0  ;;  %vm1221_vm9 = vnez %v1189_v25  ;;  %v494_v54 = vsel %vm1028_vm4, %v478_v58, 0 }
  0x73   :  { %v493_v27 = vsel %vm1221_vm9, %v477_v19, 0  ;;  %v495_v14 = vsel %vm1042_vm15, %v479_v23, 0  ;;  %v496_v42 = vsel %vm1051_vm5, %v480_v47, 0  ;;  %v497_v17 = vsel %vm1057_vm0, %v481_v22, 0 }
  0x74   :  { %v498_v20 = vsel %vm1065_vm1, %v482_v39, 0  ;;  %v499_v21 = vsel %vm1071_vm2, %v483_v28, 0  ;;  %v500_v46 = vsel %vm1077_vm6, %v484_v32, 0  ;;  %v501_v24 = vrot.slane %v486_v57, 7 }
  0x75   :  { %v502_v48 = vrot.slane %v487_v60, 6  ;;  %v503_v8 = vrot.slane %v488_v6, 5  ;;  %v504_v25 = vrot.slane %v489_v16, 4  ;;  %v505_v49 = vrot.slane %v490_v43, 3 }
  0x76   :  { %v506_v26 = vrot.slane %v491_v45, 2  ;;  %v507_v9 = vrot.slane %v492_v33, 1  ;;  %v508_v3 = vrot.slane %v494_v54, 7  ;;  %v509_v4 = vrot.slane %v495_v14, 6 }
  0x77   :  { %v510_v11 = vrot.slane %v496_v42, 5  ;;  %v511_v29 = vrot.slane %v497_v17, 4  ;;  %v512_v1 = vrot.slane %v498_v20, 3  ;;  %v513_v13 = vrot.slane %v499_v21, 2 }
  0x78   :  { %v514_v30 = vrot.slane %v500_v46, 1  ;;  %vm1222_vm11 = vcmask 1040384   ;;  %vm1223_vm12 = vcmask 1042434   ;;  %vm1224_vm13 = vcmask 1041408  }
  0x79   :  { %v515_v0 = vsel %vm1222_vm11, %v485_v41, %v501_v24  ;;  %v516_v63 = vsel %vm1223_vm12, %v502_v48, %v503_v8  ;;  %vm1225_vm14 = vcmask 1044484   ;;  %vm1226_vm15 = vcmask 1046534   ;;  %vm1227_vm4 = vmmov %vm1222_vm11 }
  0x7a   :  { %v517_v59 = vsel %vm1224_vm13, %v515_v0, %v516_v63  ;;  %v518_v53 = vsel %vm1225_vm14, %v504_v25, %v505_v49  ;;  %v519_v52 = vsel %vm1226_vm15, %v506_v26, %v507_v9  ;;  %v522_v50 = vsel %vm1227_vm4, %v493_v27, %v508_v3  ;;  %vm1228_vm5 = vmmov %vm1223_vm12 }
  0x7b   :  { %v520_v18 = vsel %vm456_vm10, %v518_v53, %v519_v52  ;;  %v523_v36 = vsel %vm1228_vm5, %v509_v4, %v510_v11  ;;  %vm1229_vm0 = vmmov %vm1225_vm14  ;;  %vm1231_vm1 = vcmask 1043456  }
  0x7c   :  { %v525_v34 = vsel %vm1229_vm0, %v511_v29, %v512_v1  ;;  %vm1230_vm3 = vmmov %vm1226_vm15  ;;  %v521_v44 = vsel %vm1231_vm1, %v517_v59, %v520_v18 }
  0x7d   :  { %v526_v40 = vsel %vm1230_vm3, %v513_v13, %v514_v30  ;;  %vm1232_vm2 = vmmov %vm1224_vm13  ;;  %529 = vst [vmem:[#allocation7] sm:$0xff] %v521_v44 }
  0x7e   :  { %v524_v51 = vsel %vm1232_vm2, %v522_v50, %v523_v36  ;;  %v527_v55 = vsel %vm456_vm10, %v525_v34, %v526_v40  ;;  %vm1233_vm6 = vmmov %vm1231_vm1 }
  0x7f   :  { %v528_v35 = vsel %vm1233_vm6, %v524_v51, %v527_v55 }
  0x80   :  { %530 = vst [vmem:[#allocation7 + $0x8] sm:$0xff] %v528_v35 }
  0x81   :  { %541 = dma.vmem_to_hbm [thread:$0]  %s537_s1, 256, %s539_s18, [#allocation6]  }
  0x82   :  { %677 = dma.done.wait [#allocation6], 256  }
  0x83   :  { %678 = vsyncadd [#allocation6], 4294967040 }
  0x84   :  { %546 = vsyncpa [#allocation5], 1 }
  0x85   :  { %547 = vsyncpa [#allocation6], 1 }

</bundles_post_ra>
